<compile_context>
chip_gen: v6e
topology: v6e:2x2x1
jax: 0.10.0
libtpu: 0.0.40
codegen_flags: <defaults>
</compile_context>

<pallas_src>
import functools

import jax
import jax.numpy as jnp
from jax.experimental import pallas as pl
from jax.experimental.pallas import tpu as pltpu

EPS = 1e-5


def _round_up(x, m):
    return (x + m - 1) // m * m


def _vmem_capacity_bytes():
    try:
        return int(pltpu.get_tpu_info().vmem_capacity_bytes)
    except Exception:
        return 64 << 20          # conservative fallback (v7x per-TC VMEM)


# ---------------------------------------------------------------------------
# pltpu.roll direction probe: returns s such that
#   pltpu.roll(x, shift=(s * off) % n, axis=-1)[m] == x[m + off]
# ---------------------------------------------------------------------------
def _detect_roll_sign():
    def probe(x_ref, o_ref):
        o_ref[...] = pltpu.roll(x_ref[...], shift=1, axis=1)

    x = jnp.tile(jnp.arange(128, dtype=jnp.float32)[None, :], (8, 1))
    out = pl.pallas_call(
        probe,
        out_shape=jax.ShapeDtypeStruct((8, 128), jnp.float32),
        grid=(1,),
        in_specs=[pl.BlockSpec((8, 128), lambda i: (0, 0))],
        out_specs=pl.BlockSpec((8, 128), lambda i: (0, 0)),
    )(x)
    row = jax.device_get(out)[0]
    if float(row[1]) == 0.0:          # out[i] = in[i - shift]  (jnp.roll style)
        return -1
    if float(row[0]) == 1.0:          # out[i] = in[i + shift]
        return 1
    raise AssertionError("unexpected pltpu.roll semantics")


# ---------------------------------------------------------------------------
# host-side channel repacking helpers (pad every channel group to 8 sublanes)
# ---------------------------------------------------------------------------
def _remap_channels(w, groups):
    """Slice channel groups along axis 1, zero-padding each to its padded size."""
    parts = []
    for start, real, padded in groups:
        blk = w[:, start:start + real]
        widths = [(0, 0)] * w.ndim
        widths[1] = (0, padded - real)
        parts.append(jnp.pad(blk, widths))
    return jnp.concatenate(parts, axis=1)


def _remap_vec(v, groups):
    parts = []
    for start, real, padded in groups:
        parts.append(jnp.pad(v[start:start + real], (0, padded - real)))
    return jnp.concatenate(parts)


def _pad_rows(w, n):
    widths = [(0, 0)] * w.ndim
    widths[0] = (0, n - w.shape[0])
    return jnp.pad(w, widths)


# ---------------------------------------------------------------------------
# fused DenseBlock kernel
# ---------------------------------------------------------------------------
def make_dense_block_kernel(N, H, W, Wp, Mp, offs, roll_sign):
    inv_cnt = 1.0 / float(N * H * W)      # BatchNorm population (interior px)

    def kernel(x_ref, mask_ref, w1_ref, w2_ref, w3_ref, pp_ref, alpha_ref,
               out_ref):
        x = x_ref[...]                     # (C0p, Mp) f32, zero outside interior
        mask = mask_ref[...]               # (1, Mp) f32, 1.0 on interior lanes
        alpha = alpha_ref[0, 0]            # PReLU slope (SMEM scalar)

        def pslice(name):                  # static slice of the packed params
            off, n = offs[name]
            return pp_ref[pl.ds(off, n), :]

        def stats(v):
            # Training-mode (biased) batch stats, two-pass variance.
            # Non-interior lanes of v are zero, so sum/cnt is the exact mean;
            # the centered pass re-masks so -mean on pad lanes doesn't leak in.
            mean = jnp.sum(v, axis=1, keepdims=True) * inv_cnt
            d = (v - mean) * mask
            var = jnp.sum(d * d, axis=1, keepdims=True) * inv_cnt
            return mean, var

        def norm_act(v, mean, var, g, b):
            # BatchNorm affine + PReLU, then zero non-interior lanes so conv
            # taps see exact Conv2d zero padding.
            scale = g * jax.lax.rsqrt(var + EPS)          # (C, 1)
            shift = b - mean * scale                      # (C, 1)
            vn = v * scale + shift
            return jnp.where(vn > 0, vn, alpha * vn) * mask

        def conv3x3(act, w_ref, b):
            # act: (Cin, Mp) f32 merged-group activation
            # w_ref: (3, 3, Fp, Cin) bf16  ->  one dot per tap.
            a16 = act.astype(jnp.bfloat16)   # cast once; rolls move packed bf16
            acc = None
            for kh in range(3):
                for kw in range(3):
                    off = (kh - 1) * Wp + (kw - 1)
                    a_s = a16 if off == 0 else pltpu.roll(
                        a16, shift=(roll_sign * off) % Mp, axis=1)
                    d = jnp.dot(w_ref[kh, kw], a_s,
                                preferred_element_type=jnp.float32)
                    acc = d if acc is None else acc + d
            return (acc + b) * mask          # masked: feeds stats / later taps

        # x-group stats are shared by BN1 / BN2 / BN3 (cat() reuses x).
        mx, vx = stats(x)

        # ---- stage 1: BN1 -> PReLU -> conv1 (3x3) --------------------------
        a1 = norm_act(x, mx, vx, pslice("g1"), pslice("bt1"))
        o3 = conv3x3(a1, w1_ref, pslice("b1"))            # (Fp, Mp)
        m3, v3 = stats(o3)

        # ---- stage 2: [x, o3] -> BN2 -> PReLU -> conv2 (3x3), merged dot ---
        cat2 = jnp.concatenate([x, o3], axis=0)            # 8-aligned groups
        a2 = norm_act(cat2,
                      jnp.concatenate([mx, m3], axis=0),
                      jnp.concatenate([vx, v3], axis=0),
                      pslice("g2"), pslice("bt2"))
        o7 = conv3x3(a2, w2_ref, pslice("b2"))             # (Fp, Mp)
        m7, v7 = stats(o7)

        # ---- stage 3: [x, o3, o7] -> BN3 -> PReLU -> conv3 (1x1), one dot --
        cat3 = jnp.concatenate([cat2, o7], axis=0)
        a3 = norm_act(cat3,
                      jnp.concatenate([mx, m3, m7], axis=0),
                      jnp.concatenate([vx, v3, v7], axis=0),
                      pslice("g3"), pslice("bt3"))
        # No mask on the final output: the wrapper slices the interior.
        out_ref[...] = (jnp.dot(w3_ref[...], a3.astype(jnp.bfloat16),
                                preferred_element_type=jnp.float32)
                        + pslice("b3"))

    return kernel


@functools.partial(jax.jit, static_argnames=("num_filters", "roll_sign"))
def dense_block_forward(x, params, num_filters, roll_sign):
    """DenseBlock.forward for NCHW input x (training-mode BatchNorm)."""
    N, C0, H, W = x.shape
    F = num_filters
    C1, C2 = C0 + F, C0 + 2 * F
    Hp, Wp = H + 2, W + 2
    L = N * Hp * Wp
    Mp = _round_up(L, 128)                 # lane-dense padded flat spatial extent

    C0p = _round_up(C0, 8)                 # 8-aligned channel groups
    Fp = _round_up(F, 8)

    (w1, b1, w2, b2, w3, b3, g1, bt1, g2, bt2, g3, bt3, alpha) = params

    # channel-group layout inside the kernel: [x | o3 | o7], each 8-aligned
    g_x = [(0, C0, C0p)]
    g_x3 = g_x + [(C0, F, Fp)]
    g_x37 = g_x3 + [(C0 + F, F, Fp)]

    # ---- repack: NCHW -> channels on sublanes, padded-flat spatial on lanes.
    # TODO(synk): for production shapes, accept a (C, N*Hp*Wp) layout from the
    # surrounding model (or fold padding/transpose into a per-N grid with
    # in-kernel DMA) so these pre/post HBM repack passes disappear.
    xp = jnp.pad(x.astype(jnp.float32), ((0, 0), (0, 0), (1, 1), (1, 1)))
    x_cm = jnp.transpose(xp, (1, 0, 2, 3)).reshape(C0, L)
    x_cm = jnp.pad(x_cm, ((0, C0p - C0), (0, Mp - L)))

    idx = jnp.arange(Mp)
    hp = (idx // Wp) % Hp
    wp = idx % Wp
    interior = (idx < L) & (hp >= 1) & (hp <= H) & (wp >= 1) & (wp <= W)
    mask = interior.astype(jnp.float32)[None, :]                    # (1, Mp)

    # ---- weights: merged channel groups, padded output filters, bf16 taps
    def tap_w(w):                          # OIHW -> (kh, kw, Fout, Cin)
        return jnp.transpose(w, (2, 3, 0, 1)).astype(jnp.bfloat16)

    w1p = tap_w(_pad_rows(_remap_channels(w1, g_x), Fp))     # (3,3,Fp,C0p)
    w2p = tap_w(_pad_rows(_remap_channels(w2, g_x3), Fp))    # (3,3,Fp,C0p+Fp)
    w3p = _remap_channels(w3.reshape(F, C2), g_x37).astype(jnp.bfloat16)

    # ---- all per-channel params packed into ONE (P,1) f32 operand
    param_list = [
        ("g1", _remap_vec(g1, g_x)), ("bt1", _remap_vec(bt1, g_x)),
        ("g2", _remap_vec(g2, g_x3)), ("bt2", _remap_vec(bt2, g_x3)),
        ("g3", _remap_vec(g3, g_x37)), ("bt3", _remap_vec(bt3, g_x37)),
        ("b1", _pad_rows(b1, Fp)), ("b2", _pad_rows(b2, Fp)), ("b3", b3),
    ]
    offs = {}
    chunks = []
    off = 0
    for name, v in param_list:
        n = int(v.shape[0])
        npad = _round_up(n, 8)
        offs[name] = (off, n)
        chunks.append(jnp.pad(v.astype(jnp.float32), (0, npad - n)))
        off += npad
    pp = jnp.concatenate(chunks).reshape(off, 1)

    vmem_operands = (x_cm, mask, w1p, w2p, w3p, pp)
    # TODO(synk): per-channel PReLU (num_parameters=C) would need a (C,1)
    # operand; the module uses nn.PReLU() with a single shared alpha.
    alpha_smem = jnp.asarray(alpha, jnp.float32).reshape(1, 1)

    def vspec(shape):
        nd = len(shape)
        return pl.BlockSpec(shape, lambda i, nd=nd: (0,) * nd)

    in_specs = [vspec(op.shape) for op in vmem_operands]
    in_specs.append(pl.BlockSpec(memory_space=pltpu.MemorySpace.SMEM))

    est = sum(op.size * op.dtype.itemsize for op in vmem_operands) + F * Mp * 4
    vmem_cap = int(0.75 * _vmem_capacity_bytes())       # clamp to this device
    vmem_limit = int(min(max(6 * est, 32 << 20), vmem_cap))

    kernel = make_dense_block_kernel(N, H, W, Wp, Mp, offs, roll_sign)

    # TODO(synk): for production-size feature maps, add a row-tiled "parallel"
    # grid axis (1-row halo, two-pass BatchNorm: stats pass then normalize+conv)
    # sized for v7x's 64 MiB VMEM / 2 TCs, with ~2x larger tiles on v6e/v5e;
    # at these test shapes one fused step is optimal.
    out_cm = pl.pallas_call(
        kernel,
        out_shape=jax.ShapeDtypeStruct((F, Mp), jnp.float32),
        grid=(1,),
        in_specs=in_specs,
        out_specs=vspec((F, Mp)),
        compiler_params=pltpu.CompilerParams(
            dimension_semantics=("arbitrary",),
            vmem_limit_bytes=vmem_limit),
    )(*vmem_operands, alpha_smem)

    out = out_cm[:, :L].reshape(F, N, Hp, Wp)[:, :, 1:H + 1, 1:W + 1]
    return jnp.transpose(out, (1, 0, 2, 3))                          # NCHW


# ------------------------- pure-JAX reference -------------------------------
def reference_forward(x, params, num_filters):
    (w1, b1, w2, b2, w3, b3, g1, bt1, g2, bt2, g3, bt3, alpha) = params

    def bn(v, g, b):
        mean = jnp.mean(v, axis=(0, 2, 3), keepdims=True)
        var = jnp.var(v, axis=(0, 2, 3), keepdims=True)
        return ((v - mean) / jnp.sqrt(var + EPS) * g.reshape(1, -1, 1, 1)
                + b.reshape(1, -1, 1, 1))

    def prelu(v):
        return jnp.where(v > 0, v, alpha * v)

    def conv(v, w, b, pad):
        y = jax.lax.conv_general_dilated(
            v, w, (1, 1), [(pad, pad), (pad, pad)],
            dimension_numbers=("NCHW", "OIHW", "NCHW"))
        return y + b.reshape(1, -1, 1, 1)

    o3 = conv(prelu(bn(x, g1, bt1)), w1, b1, 1)
    o4 = jnp.concatenate([x, o3], axis=1)
    o7 = conv(prelu(bn(o4, g2, bt2)), w2, b2, 1)
    o8 = jnp.concatenate([x, o3, o7], axis=1)
    return conv(prelu(bn(o8, g3, bt3)), w3, b3, 0)


# ----------------------------------- main -----------------------------------
if __name__ == "__main__":
    # DenseBlock config: num_channels=8, num_filters=4, kernel 3x3, stride 1,
    # drop_out=0, se_block_type=None.
    # TODO(synk): SELayer variants and Dropout2d are disabled by this config
    # and are not implemented in the kernel.
    N, C0, H, W, F = 2, 8, 16, 16, 4
    C1, C2 = C0 + F, C0 + 2 * F

    key = jax.random.PRNGKey(0)
    ks = jax.random.split(key, 13)
    x = jax.random.normal(ks[0], (N, C0, H, W), jnp.float32)

    w1 = 0.1 * jax.random.normal(ks[1], (F, C0, 3, 3), jnp.float32)
    b1 = 0.1 * jax.random.normal(ks[2], (F,), jnp.float32)
    w2 = 0.1 * jax.random.normal(ks[3], (F, C1, 3, 3), jnp.float32)
    b2 = 0.1 * jax.random.normal(ks[4], (F,), jnp.float32)
    w3 = 0.1 * jax.random.normal(ks[5], (F, C2, 1, 1), jnp.float32)
    b3 = 0.1 * jax.random.normal(ks[6], (F,), jnp.float32)
    g1 = 1.0 + 0.1 * jax.random.normal(ks[7], (C0,), jnp.float32)
    bt1 = 0.1 * jax.random.normal(ks[8], (C0,), jnp.float32)
    g2 = 1.0 + 0.1 * jax.random.normal(ks[9], (C1,), jnp.float32)
    bt2 = 0.1 * jax.random.normal(ks[10], (C1,), jnp.float32)
    g3 = 1.0 + 0.1 * jax.random.normal(ks[11], (C2,), jnp.float32)
    bt3 = 0.1 * jax.random.normal(ks[12], (C2,), jnp.float32)
    alpha = jnp.array(0.25, jnp.float32)
    params = (w1, b1, w2, b2, w3, b3, g1, bt1, g2, bt2, g3, bt3, alpha)

    roll_sign = _detect_roll_sign()
    out = dense_block_forward(x, params, num_filters=F, roll_sign=roll_sign)
    out = jax.block_until_ready(out)

    ref = reference_forward(x, params, F)
    err = float(jnp.max(jnp.abs(out - ref)))
    assert out.shape == (N, F, H, W), out.shape
    assert err < 5e-2, f"max abs error too large: {err}"

    print("KERNEL_OK")
</pallas_src>

<mosaic_0001>
module attributes {stable_mosaic.version = 11 : i64} {
  func.func @probe(%arg0: i32, %arg1: memref<8x128xf32, #tpu.memory_space<vmem>>, %arg2: memref<8x128xf32, #tpu.memory_space<vmem>>) attributes {dimension_semantics = [#tpu.dimension_semantics<arbitrary>], iteration_bounds = array<i64: 1>, scalar_prefetch = 0 : i64, scratch_operands = 0 : i64, tpu.core_type = #tpu.core_type<tc>, window_params = [{pipeline_mode = #tpu.pipeline_mode<synchronous>, transform_indices = @transform_0, window_bounds = array<i64: 8, 128>}, {pipeline_mode = #tpu.pipeline_mode<synchronous>, transform_indices = @transform_1, window_bounds = array<i64: 8, 128>}]} {
    %c0 = arith.constant 0 : index
    %c0_0 = arith.constant 0 : index
    %0 = vector.load %arg1[%c0, %c0_0] : memref<8x128xf32, #tpu.memory_space<vmem>>, vector<8x128xf32>
    %c1_i32 = arith.constant 1 : i32
    %1 = tpu.dynamic_rotate %0 by %c1_i32 dim 1 : vector<8x128xf32>, i32 -> vector<8x128xf32>
    %c0_1 = arith.constant 0 : index
    %c0_2 = arith.constant 0 : index
    %2 = vector.load %arg2[%c0_1, %c0_2] : memref<8x128xf32, #tpu.memory_space<vmem>>, vector<8x128xf32>
    tpu.vector_store %arg2[%c0_1, %c0_2], %1 {strides = array<i32>} : memref<8x128xf32, #tpu.memory_space<vmem>>, vector<8x128xf32>,
    return
  }
  func.func @transform_0(%arg0: i32) -> (i32, i32) {
    %c0_i32 = arith.constant 0 : i32
    %c0_i32_0 = arith.constant 0 : i32
    %c0_i32_1 = arith.constant 0 : i32
    return %c0_i32, %c0_i32_0 : i32, i32
  }
  func.func @transform_1(%arg0: i32) -> (i32, i32) {
    %c0_i32 = arith.constant 0 : i32
    %c0_i32_0 = arith.constant 0 : i32
    %c0_i32_1 = arith.constant 0 : i32
    return %c0_i32, %c0_i32_0 : i32, i32
  }
}

</mosaic_0001>

<bundles_post_ra>
// kernel: tpu_custom_call.1
= control target key start
LH: loop header
LB: loop body
LE: loop exit
PB: predicated region body
PF: predicated region fallthrough
CT: control target
= control target key end

     0   :  { %6 = vsyncpa [#allocation3], 0  ;;  %s106_s0 = inlined_call_operand.hbm [shape: f32[8,128], index: 0, kind: input, shape index: {}]   ;;  %s107_s1 = inlined_call_operand.hbm [shape: f32[8,128], index: 1, kind: output, shape index: {}]  }
   0x1   :  { %7 = vsyncpa [#allocation4], 0  ;;  %s87_s6 = smov [#allocation2]  }
   0x2   :  { %s14_s7 = sshll.u32 %s87_s6, 4  ;;  %s15_s7 = int_to_ptr.vmem [resolvable:$true] %s14_s7 }
   0x3   :  { %s51_s8 = scalar_lea.vmem %s15_s7, 128  ;;  %p56_p1 = scmp.lt.s32.totalorder %s15_s7, %s15_s7 }
   0x4   :  { %p52_p0 = scmp.ne.s32.totalorder %s15_s7, %s51_s8  ;;  %p57_p2 = scmp.lt.s32.totalorder %s51_s8, %s51_s8 }
   0x6   :  { %p58_p3 = por %p57_p2, %p56_p1 }
   0x8   :  { %p59_p4 = pnand %p58_p3, %p52_p0 }
   0xa   :  { %62 = shalt.err (!%p59_p4)
}
   0xb   :  { %17 = dma.hbm_to_vmem [thread:$0]  %s106_s0, 128, %s15_s7, [#allocation3]  }
   0xc   :  { %83 = dma.done.wait [#allocation3], 128  }
   0xd   :  { %84 = vsyncadd [#allocation3], 4294967168  ;;  %v21_v0 = vld [vmem:[#allocation2] sm:$0xff]  ;;  %s88_s11 = smov 1   ;;  %s89_s12 = smov [#allocation5]  }
   0xe   :  { %22 = vrot.lane.b32.xlu0 %v21_v0, %s88_s11  ;;  %s31_s13 = sshll.u32 %s89_s12, 4  ;;  %s32_s13 = int_to_ptr.vmem [resolvable:$true] %s31_s13 }
   0xf   :  { %s63_s14 = scalar_lea.vmem %s32_s13, 128  ;;  %p68_p6 = scmp.lt.s32.totalorder %s32_s13, %s32_s13 }
  0x10   :  { %p64_p5 = scmp.ne.s32.totalorder %s32_s13, %s63_s14  ;;  %p69_p7 = scmp.lt.s32.totalorder %s63_s14, %s63_s14 }
  0x12   :  { %p70_p8 = por %p69_p7, %p68_p6 }
  0x14   :  { %p71_p9 = pnand %p70_p8, %p64_p5 }
  0x80   :  { %v23_v1 = vpop.permute.xlu0 %22 }
  0x81   :  { %24 = vst [vmem:[#allocation5] sm:$0xff] %v23_v1 }
  0x82   :  { %74 = shalt.err (!%p71_p9)
}
  0x83   :  { %34 = dma.vmem_to_hbm [thread:$0]  %s32_s13, 128, %s107_s1, [#allocation4]  }
  0x84   :  { %85 = dma.done.wait [#allocation4], 128  }
  0x85   :  { %86 = vsyncadd [#allocation4], 4294967168 }
  0x86   :  { %38 = vsyncpa [#allocation3], 1 }
  0x87   :  { %39 = vsyncpa [#allocation4], 1 }

</bundles_post_ra>
